<compile_context>
chip_gen: v6e
topology: v6e:2x2x1
jax: 0.10.0
libtpu: 0.0.40
codegen_flags: <defaults>
</compile_context>

<pallas_src>
import functools

import jax
import jax.numpy as jnp
from jax import lax
from jax.experimental import pallas as pl
from jax.experimental.pallas import tpu as pltpu


def _round_up(x, m):
    return ((x + m - 1) // m) * m


def disc_kernel(x_ref, w1_ref, b1_ref, w2_ref, b2_ref, w3t_ref, b3_ref, o_ref):
    xt = x_ref[...].astype(jnp.bfloat16)                                   # [tb, 10] bf16

    # Layer 1: contract the feature dim of BOTH operands (W1 @ X^T) so the result is
    # [50, tb] with batch on lanes -- no wrapper-side or HBM-level transpose of x.
    h1 = lax.dot_general(w1_ref[...].astype(jnp.bfloat16), xt,
                         (((1,), (1,)), ((), ())),
                         preferred_element_type=jnp.float32)               # [50, tb] f32
    h1 = jnp.maximum(h1 + b1_ref[...], 0.0)                                # bias+ReLU in f32

    # Layer 2: plain MXU matmul; tiny [20, 50] weight is resident across batch tiles.
    h2 = jnp.dot(w2_ref[...].astype(jnp.bfloat16), h1.astype(jnp.bfloat16),
                 preferred_element_type=jnp.float32)                       # [20, tb] f32
    h2 = jnp.maximum(h2 + b2_ref[...], 0.0)

    # Layer 3 (single output row): VPU broadcast-mul + sublane reduce instead of a full
    # MXU pass over the tile; keeps the [1, tb] lane-dense store.
    out = jnp.sum(h2 * w3t_ref[...], axis=0, keepdims=True) + b3_ref[...]  # [1, tb] f32
    o_ref[...] = out.astype(o_ref.dtype)


@functools.partial(jax.jit, static_argnames=("block_b",))
def disc_forward(x, w1, b1, w2, b2, w3, b3, *, block_b=8192):
    """x: [B, 10] f32.  Weights in PyTorch layout: w [out, in], b [out, 1]. Returns [B, 1] f32."""
    B, D_in = x.shape
    assert D_in == 10

    # Batch tile (lane axis of hidden activations): multiple of 128, capped at block_b,
    # and <= ~B/2 so the "parallel" grid has >= 2 steps whenever B > 128 (v7x megacore).
    tb = max(128, min(_round_up(block_b, 128), _round_up(pl.cdiv(B, 2), 128)))
    grid = (pl.cdiv(B, tb),)

    w3t = jnp.transpose(w3)  # [20, 1]: layer-3 weights as a column, broadcast over lanes (tiny)

    def full(shape):  # tiny weights/biases: full blocks, resident across all batch tiles
        return pl.BlockSpec(shape, lambda i: (0,) * len(shape))

    out = pl.pallas_call(
        disc_kernel,
        out_shape=jax.ShapeDtypeStruct((1, B), jnp.float32),
        grid_spec=pltpu.PrefetchScalarGridSpec(
            num_scalar_prefetch=0,
            grid=grid,
            in_specs=[
                pl.BlockSpec((tb, 10), lambda i: (i, 0)),       # x tile, natural [B, 10] layout
                full(w1.shape), full(b1.shape),
                full(w2.shape), full(b2.shape),
                full(w3t.shape), full(b3.shape),
            ],
            out_specs=pl.BlockSpec((1, tb), lambda i: (0, i)),  # lane-dense [1, tb] output slab
        ),
        compiler_params=pltpu.CompilerParams(
            dimension_semantics=("parallel",)),
    )(x, w1, b1, w2, b2, w3t, b3)                               # [1, B]

    return jnp.transpose(out)                                   # [B, 1] (module semantics)


def init_params(key):
    """Deterministic init matching nn.Linear (w: [out, in], b: [out, 1])."""
    ks = jax.random.split(key, 6)

    def linear(kw, kb, fan_in, fan_out):
        bound = 1.0 / jnp.sqrt(fan_in)
        w = jax.random.uniform(kw, (fan_out, fan_in), jnp.float32, -bound, bound)
        b = jax.random.uniform(kb, (fan_out, 1), jnp.float32, -bound, bound)
        return w, b

    w1, b1 = linear(ks[0], ks[1], 10, 50)
    w2, b2 = linear(ks[2], ks[3], 50, 20)
    w3, b3 = linear(ks[4], ks[5], 20, 1)
    return w1, b1, w2, b2, w3, b3


def disc_reference_bf16(x, w1, b1, w2, b2, w3, b3):
    """Reference mirroring the kernel's bf16-operand / f32-accumulate numerics."""
    bf = jnp.bfloat16
    h1 = lax.dot_general(w1.astype(bf), x.astype(bf), (((1,), (1,)), ((), ())),
                         preferred_element_type=jnp.float32)          # [50, B]
    h1 = jnp.maximum(h1 + b1, 0.0)
    h2 = jnp.dot(w2.astype(bf), h1.astype(bf), preferred_element_type=jnp.float32)
    h2 = jnp.maximum(h2 + b2, 0.0)
    out = jnp.dot(w3, h2, preferred_element_type=jnp.float32) + b3     # layer 3 stays f32
    return jnp.transpose(out)                                          # [B, 1]


def disc_reference_f32(x, w1, b1, w2, b2, w3, b3):
    """Pure f32 reference (module semantics)."""
    h1 = jnp.maximum(x @ w1.T + b1.T, 0.0)
    h2 = jnp.maximum(h1 @ w2.T + b2.T, 0.0)
    return h2 @ w3.T + b3.T


if __name__ == "__main__":
    key = jax.random.PRNGKey(0)
    k_x, k_x2, k_p = jax.random.split(key, 3)
    params = init_params(k_p)

    # Small shape consistent with the module (features = 10); single partial tile.
    B = 8
    x = jax.random.normal(k_x, (B, 10), jnp.float32)
    out = jax.block_until_ready(disc_forward(x, *params))
    assert out.shape == (B, 1), out.shape
    assert jnp.allclose(out, disc_reference_bf16(x, *params), atol=2e-3, rtol=1e-3), \
        "mismatch vs bf16 reference"
    assert jnp.allclose(out, disc_reference_f32(x, *params), atol=5e-2, rtol=5e-2), \
        "mismatch vs f32 reference"

    # Second shape: >= 2 grid steps (tb=256) plus a masked partial edge block.
    B2 = 300
    x2 = jax.random.normal(k_x2, (B2, 10), jnp.float32)
    out2 = jax.block_until_ready(disc_forward(x2, *params))
    assert out2.shape == (B2, 1), out2.shape
    assert jnp.allclose(out2, disc_reference_bf16(x2, *params), atol=2e-3, rtol=1e-3), \
        "mismatch vs bf16 reference (partial edge tile)"

    print("KERNEL_OK")
</pallas_src>

<mosaic_0001>
module attributes {stable_mosaic.version = 11 : i64} {
  func.func @disc_kernel(%arg0: i32, %arg1: memref<128x10xf32, #tpu.memory_space<vmem>>, %arg2: memref<50x10xf32, #tpu.memory_space<vmem>>, %arg3: memref<50x1xf32, #tpu.memory_space<vmem>>, %arg4: memref<20x50xf32, #tpu.memory_space<vmem>>, %arg5: memref<20x1xf32, #tpu.memory_space<vmem>>, %arg6: memref<20x1xf32, #tpu.memory_space<vmem>>, %arg7: memref<1x1xf32, #tpu.memory_space<vmem>>, %arg8: memref<1x128xf32, #tpu.memory_space<vmem>>) attributes {dimension_semantics = [#tpu.dimension_semantics<parallel>], iteration_bounds = array<i64: 1>, scalar_prefetch = 0 : i64, scratch_operands = 0 : i64, tpu.core_type = #tpu.core_type<tc>, window_params = [{transform_indices = @transform_0, window_bounds = array<i64: 128, 10>}, {pipeline_mode = #tpu.pipeline_mode<synchronous>, transform_indices = @transform_1, window_bounds = array<i64: 50, 10>}, {pipeline_mode = #tpu.pipeline_mode<synchronous>, transform_indices = @transform_2, window_bounds = array<i64: 50, 1>}, {pipeline_mode = #tpu.pipeline_mode<synchronous>, transform_indices = @transform_3, window_bounds = array<i64: 20, 50>}, {pipeline_mode = #tpu.pipeline_mode<synchronous>, transform_indices = @transform_4, window_bounds = array<i64: 20, 1>}, {pipeline_mode = #tpu.pipeline_mode<synchronous>, transform_indices = @transform_5, window_bounds = array<i64: 20, 1>}, {pipeline_mode = #tpu.pipeline_mode<synchronous>, transform_indices = @transform_6, window_bounds = array<i64: 1, 1>}, {transform_indices = @transform_7, window_bounds = array<i64: 1, 128>}]} {
    %c0 = arith.constant 0 : index
    %c0_0 = arith.constant 0 : index
    %0 = vector.load %arg1[%c0, %c0_0] : memref<128x10xf32, #tpu.memory_space<vmem>>, vector<128x10xf32>
    %1 = arith.truncf %0 : vector<128x10xf32> to vector<128x10xbf16>
    %c0_1 = arith.constant 0 : index
    %c0_2 = arith.constant 0 : index
    %2 = vector.load %arg2[%c0_1, %c0_2] : memref<50x10xf32, #tpu.memory_space<vmem>>, vector<50x10xf32>
    %3 = arith.truncf %2 : vector<50x10xf32> to vector<50x10xbf16>
    %cst = arith.constant dense<0.000000e+00> : vector<50x128xf32>
    %4 = tpu.matmul %3, %1, %cst {dimension_numbers = #tpu.dot_dimension_numbers<[1], [1], [0], [0], [0, 0, 1, 0], [], []>} : vector<50x10xbf16>, vector<128x10xbf16>, vector<50x128xf32> -> vector<50x128xf32>
    %c0_3 = arith.constant 0 : index
    %c0_4 = arith.constant 0 : index
    %5 = vector.load %arg3[%c0_3, %c0_4] : memref<50x1xf32, #tpu.memory_space<vmem>>, vector<50x1xf32>
    %6 = vector.broadcast %5 : vector<50x1xf32> to vector<50x128xf32>
    %7 = arith.addf %4, %6 : vector<50x128xf32>
    %cst_5 = arith.constant 0.000000e+00 : f32
    %8 = vector.broadcast %cst_5 : f32 to vector<50x128xf32>
    %9 = arith.maximumf %7, %8 : vector<50x128xf32>
    %c0_6 = arith.constant 0 : index
    %c0_7 = arith.constant 0 : index
    %10 = vector.load %arg4[%c0_6, %c0_7] : memref<20x50xf32, #tpu.memory_space<vmem>>, vector<20x50xf32>
    %11 = arith.truncf %10 : vector<20x50xf32> to vector<20x50xbf16>
    %12 = arith.truncf %9 : vector<50x128xf32> to vector<50x128xbf16>
    %cst_8 = arith.constant dense<0.000000e+00> : vector<20x128xf32>
    %13 = tpu.matmul %11, %12, %cst_8 {dimension_numbers = #tpu.dot_dimension_numbers<[1], [0], [0], [1], [0, 0, 1, 1], [], []>} : vector<20x50xbf16>, vector<50x128xbf16>, vector<20x128xf32> -> vector<20x128xf32>
    %c0_9 = arith.constant 0 : index
    %c0_10 = arith.constant 0 : index
    %14 = vector.load %arg5[%c0_9, %c0_10] : memref<20x1xf32, #tpu.memory_space<vmem>>, vector<20x1xf32>
    %15 = vector.broadcast %14 : vector<20x1xf32> to vector<20x128xf32>
    %16 = arith.addf %13, %15 : vector<20x128xf32>
    %cst_11 = arith.constant 0.000000e+00 : f32
    %17 = vector.broadcast %cst_11 : f32 to vector<20x128xf32>
    %18 = arith.maximumf %16, %17 : vector<20x128xf32>
    %c0_12 = arith.constant 0 : index
    %c0_13 = arith.constant 0 : index
    %19 = vector.load %arg6[%c0_12, %c0_13] : memref<20x1xf32, #tpu.memory_space<vmem>>, vector<20x1xf32>
    %20 = vector.broadcast %19 : vector<20x1xf32> to vector<20x128xf32>
    %21 = arith.mulf %18, %20 : vector<20x128xf32>
    %cst_14 = arith.constant dense<0.000000e+00> : vector<128xf32>
    %22 = vector.multi_reduction <add>, %21, %cst_14 [0] : vector<20x128xf32> to vector<128xf32>
    %23 = vector.shape_cast %22 : vector<128xf32> to vector<1x128xf32>
    %c0_15 = arith.constant 0 : index
    %c0_16 = arith.constant 0 : index
    %24 = vector.load %arg7[%c0_15, %c0_16] : memref<1x1xf32, #tpu.memory_space<vmem>>, vector<1x1xf32>
    %25 = vector.broadcast %24 : vector<1x1xf32> to vector<1x128xf32>
    %26 = arith.addf %23, %25 : vector<1x128xf32>
    %c0_17 = arith.constant 0 : index
    %c0_18 = arith.constant 0 : index
    %27 = vector.load %arg8[%c0_17, %c0_18] : memref<1x128xf32, #tpu.memory_space<vmem>>, vector<1x128xf32>
    tpu.vector_store %arg8[%c0_17, %c0_18], %26 {strides = array<i32>} : memref<1x128xf32, #tpu.memory_space<vmem>>, vector<1x128xf32>,
    return
  }
  func.func @transform_0(%arg0: i32) -> (i32, i32) {
    %c0_i32 = arith.constant 0 : i32
    %c0_i32_0 = arith.constant 0 : i32
    return %arg0, %c0_i32 : i32, i32
  }
  func.func @transform_1(%arg0: i32) -> (i32, i32) {
    %c0_i32 = arith.constant 0 : i32
    %c0_i32_0 = arith.constant 0 : i32
    %c0_i32_1 = arith.constant 0 : i32
    return %c0_i32, %c0_i32_0 : i32, i32
  }
  func.func @transform_2(%arg0: i32) -> (i32, i32) {
    %c0_i32 = arith.constant 0 : i32
    %c0_i32_0 = arith.constant 0 : i32
    %c0_i32_1 = arith.constant 0 : i32
    return %c0_i32, %c0_i32_0 : i32, i32
  }
  func.func @transform_3(%arg0: i32) -> (i32, i32) {
    %c0_i32 = arith.constant 0 : i32
    %c0_i32_0 = arith.constant 0 : i32
    %c0_i32_1 = arith.constant 0 : i32
    return %c0_i32, %c0_i32_0 : i32, i32
  }
  func.func @transform_4(%arg0: i32) -> (i32, i32) {
    %c0_i32 = arith.constant 0 : i32
    %c0_i32_0 = arith.constant 0 : i32
    %c0_i32_1 = arith.constant 0 : i32
    return %c0_i32, %c0_i32_0 : i32, i32
  }
  func.func @transform_5(%arg0: i32) -> (i32, i32) {
    %c0_i32 = arith.constant 0 : i32
    %c0_i32_0 = arith.constant 0 : i32
    %c0_i32_1 = arith.constant 0 : i32
    return %c0_i32, %c0_i32_0 : i32, i32
  }
  func.func @transform_6(%arg0: i32) -> (i32, i32) {
    %c0_i32 = arith.constant 0 : i32
    %c0_i32_0 = arith.constant 0 : i32
    %c0_i32_1 = arith.constant 0 : i32
    return %c0_i32, %c0_i32_0 : i32, i32
  }
  func.func @transform_7(%arg0: i32) -> (i32, i32) {
    %c0_i32 = arith.constant 0 : i32
    %c0_i32_0 = arith.constant 0 : i32
    return %c0_i32, %arg0 : i32, i32
  }
}

</mosaic_0001>

<bundles_post_ra>
// kernel: disc_forward.1
= control target key start
LH: loop header
LB: loop body
LE: loop exit
PB: predicated region body
PF: predicated region fallthrough
CT: control target
= control target key end

     0   :  { %s643_s0 = inlined_call_operand.vmem [shape: f32[8,10], index: 0, kind: input, shape index: {}]   ;;  %s644_s1 = inlined_call_operand.vmem [shape: f32[50,10], index: 1, kind: input, shape index: {}]   ;;  %s645_s2 = inlined_call_operand.vmem [shape: f32[50,1], index: 2, kind: input, shape index: {}]   ;;  %s646_s3 = inlined_call_operand.vmem [shape: f32[20,50], index: 3, kind: input, shape index: {}]   ;;  %s647_s4 = inlined_call_operand.vmem [shape: f32[20,1], index: 4, kind: input, shape index: {}]   ;;  %s648_s5 = inlined_call_operand.vmem [shape: f32[20,1], index: 5, kind: input, shape index: {}]   ;;  %s649_s6 = inlined_call_operand.<no memory space> [shape: f32[1,1], index: 6, kind: input, shape index: {}]   ;;  %s650_s7 = inlined_call_operand.hbm [shape: f32[1,8], index: 7, kind: output, shape index: {}]  }
   0x1   :  { %v12_v0 = vstv %s649_s6 }
   0x2   :  { %13 = vst [vmem:[#allocation2] sm:$0x1] %v12_v0 }
   0x3   :  { %v44_v1 = vld [vmem:[%s643_s0 + $0x70] sm:$0xff]  ;;  %v45_v2 = vld [vmem:[%s643_s0 + $0x78] sm:$0xff]  ;;  %vm107_vm0 = vcmask 80896   ;;  %v42_v3 = vld [vmem:[%s643_s0 + $0x60] sm:$0xff]  ;;  %v456_v6 = vmov 0  }
   0x4   :  { %v53_v4 = vpack.c.bf16 %v45_v2, %v44_v1  ;;  %v43_v5 = vld [vmem:[%s643_s0 + $0x68] sm:$0xff]  ;;  %432 = vset.pattern.permute.xlu0 %v456_v6  ;;  %433 = vset.pattern.permute.xlu1 %v456_v6  ;;  %v54_v9 = vld [vmem:[%s644_s1] sm:$0xff]  ;;  %v40_v11 = vld [vmem:[%s643_s0 + $0x50] sm:$0xff] }
   0x5   :  { %v52_v7 = vpack.c.bf16 %v43_v5, %v42_v3  ;;  %v55_v10 = vld [vmem:[%s644_s1 + $0x8] sm:$0xff]  ;;  %v41_v12 = vld [vmem:[%s643_s0 + $0x58] sm:$0xff]  ;;  %v71_v14 = vld [vmem:[%s645_s2 + $0x30] sm:$0x3] }
   0x6   :  { %421 = vmatprep.subr.msk.bf16.mxu0 %vm107_vm0, %v53_v4  ;;  %v142_v8 = vsel %vm107_vm0, %v53_v4, 0  ;;  %v61_v13 = vpack.c.bf16 %v55_v10, %v54_v9  ;;  %104 = vperm.xlu0 %432, %v71_v14   ;;  %v70_v15 = vld [vmem:[%s645_s2 + $0x28] sm:$0xff]  ;;  %v51_v17 = vpack.c.bf16 %v41_v12, %v40_v11  ;;  %v69_v18 = vld [vmem:[%s645_s2 + $0x20] sm:$0xff]  ;;  %v67_v19 = vld [vmem:[%s645_s2 + $0x10] sm:$0xff] }
   0x7   :  { %386 = vmatpush3.bf16.xpose.msra.mxu0 %v142_v8  ;;  %v139_v16 = vsel %vm107_vm0, %v52_v7, 0  ;;  %99 = vperm.xlu1 %433, %v70_v15  }
   0x8   :  { %422 = vmatprep.subr.msk.bf16.mxu0 %vm107_vm0, %v52_v7  ;;  %401 = vmatprep.mubr.msk.bf16.mxu0 %vm107_vm0, %v61_v13 }
   0xa   :  { %94 = vperm.xlu0 %432, %v69_v18  }
   0xf   :  { %388 = vmatpush3.bf16.xpose.msra.mxu0 %v139_v16 }
  0x10   :  { %14 = vsyncpa [#allocation4], 0  ;;  %423 = vmatprep.subr.msk.bf16.mxu0 %vm107_vm0, %v51_v17  ;;  %v68_v20 = vld [vmem:[%s645_s2 + $0x18] sm:$0xff]  ;;  %84 = vperm.xlu1 %433, %v67_v19   ;;  %v38_v21 = vld [vmem:[%s643_s0 + $0x40] sm:$0xff]  ;;  %v136_v24 = vsel %vm107_vm0, %v51_v17, 0  ;;  %vm242_vm1 = vcmask 408576  }
  0x11   :  { %v39_v22 = vld [vmem:[%s643_s0 + $0x48] sm:$0xff]  ;;  %v65_v23 = vld [vmem:[%s645_s2] sm:$0xff]  ;;  %89 = vperm.xlu0 %432, %v68_v20   ;;  %v36_v29 = vld [vmem:[%s643_s0 + $0x30] sm:$0xff]  ;;  %vm249_vm2 = vcmask 1040384   ;;  %vm326_vm3 = vcmask 1043456  }
  0x12   :  { %v50_v25 = vpack.c.bf16 %v39_v22, %v38_v21  ;;  %v66_v26 = vld [vmem:[%s645_s2 + $0x8] sm:$0xff]  ;;  %v224_v27 = vld [vmem:[%s647_s4] sm:$0xff]  ;;  %v37_v30 = vld [vmem:[%s643_s0 + $0x38] sm:$0xff] }
  0x13   :  { %v225_v28 = vld [vmem:[%s647_s4 + $0x8] sm:$0xff]  ;;  %v226_v31 = vld [vmem:[%s647_s4 + $0x10] sm:$0xf]  ;;  %v49_v33 = vpack.c.bf16 %v37_v30, %v36_v29  ;;  %v304_v34 = vld [vmem:[%s648_s5] sm:$0xff] }
  0x14   :  { %74 = vperm.xlu1 %433, %v65_v23   ;;  %v133_v32 = vsel %vm107_vm0, %v50_v25, 0  ;;  %v305_v35 = vld [vmem:[%s648_s5 + $0x8] sm:$0xff]  ;;  %v306_v36 = vld [vmem:[%s648_s5 + $0x10] sm:$0xf]  ;;  %v34_v37 = vld [vmem:[%s643_s0 + $0x20] sm:$0xff] }
  0x15   :  { %79 = vperm.xlu0 %432, %v66_v26   ;;  %v35_v38 = vld [vmem:[%s643_s0 + $0x28] sm:$0xff]  ;;  %v335_v39 = vld [vmem:[#allocation2] sm:$0x1]  ;;  %v130_v40 = vsel %vm107_vm0, %v49_v33, 0  ;;  %v32_v42 = vld [vmem:[%s643_s0 + $0x10] sm:$0xff] }
  0x16   :  { %v48_v41 = vpack.c.bf16 %v35_v38, %v34_v37  ;;  %v33_v43 = vld [vmem:[%s643_s0 + $0x18] sm:$0xff]  ;;  %v30_v46 = vld [vmem:[%s643_s0] sm:$0xff]  ;;  %v31_v47 = vld [vmem:[%s643_s0 + $0x8] sm:$0xff] }
  0x17   :  { %390 = vmatpush3.bf16.xpose.msra.mxu0 %v136_v24  ;;  %v47_v45 = vpack.c.bf16 %v33_v43, %v32_v42  ;;  %v46_v49 = vpack.c.bf16 %v31_v47, %v30_v46  ;;  %v56_v51 = vld [vmem:[%s644_s1 + $0x10] sm:$0xff]  ;;  %v57_v52 = vld [vmem:[%s644_s1 + $0x18] sm:$0xff]  ;;  %v58_v53 = vld [vmem:[%s644_s1 + $0x20] sm:$0xff] }
  0x18   :  { %424 = vmatprep.subr.msk.bf16.mxu0 %vm107_vm0, %v50_v25  ;;  %229 = vperm.xlu1 %433, %v224_v27   ;;  %v127_v44 = vsel %vm107_vm0, %v48_v41, 0  ;;  %v59_v54 = vld [vmem:[%s644_s1 + $0x28] sm:$0xff]  ;;  %v62_v55 = vpack.c.bf16 %v57_v52, %v56_v51  ;;  %v60_v57 = vld [vmem:[%s644_s1 + $0x30] sm:$0x3]  ;;  %v215_v59 = vld [vmem:[%s646_s3] sm:$0xff] }
  0x19   :  { %234 = vperm.xlu0 %432, %v225_v28   ;;  %v124_v48 = vsel %vm107_vm0, %v47_v45, 0  ;;  %v121_v50 = vsel %vm107_vm0, %v46_v49, 0  ;;  %v63_v56 = vpack.c.bf16 %v59_v54, %v58_v53  ;;  %v64_v58 = vpack.c.bf16 %v60_v57, %v60_v57  ;;  %v216_v60 = vld [vmem:[%s646_s3 + $0x8] sm:$0xff] }
  0x1a   :  { %v218_v61 = vpack.c.bf16 %v216_v60, %v215_v59 }
  0x1c   :  { %239 = vperm.xlu1 %433, %v226_v31   ;;  %417 = vmatprep.mubr.msk.bf16.mxu1 %vm242_vm1, %v218_v61 }
  0x1d   :  { %309 = vperm.xlu0 %432, %v304_v34  }
  0x1f   :  { %392 = vmatpush3.bf16.xpose.msra.mxu0 %v133_v32  ;;  %v217_v32 = vld [vmem:[%s646_s3 + $0x10] sm:$0xf]  ;;  %s457_s3 = smov [#allocation3]  }
  0x20   :  { %425 = vmatprep.subr.msk.bf16.mxu0 %vm107_vm0, %v49_v33  ;;  %314 = vperm.xlu1 %433, %v305_v35   ;;  %v219_v33 = vpack.c.bf16 %v217_v32, %v217_v32  ;;  %s353_s26 = sshll.u32 %s457_s3, 4  ;;  %s354_s26 = int_to_ptr.vmem [resolvable:$true] %s353_s26 }
  0x21   :  { %319 = vperm.xlu0 %432, %v306_v36   ;;  %s434_s4 = scalar_lea.vmem %s354_s26, 16  ;;  %s438_s27 = scalar_lea.vmem %s354_s26, 32 }
  0x22   :  { %p435_p0 = scmp.ne.s32.totalorder %s354_s26, %s434_s4  ;;  %p439_p1 = scmp.lt.s32.totalorder %s354_s26, %s354_s26 }
  0x23   :  { %p440_p2 = scmp.lt.s32.totalorder %s438_s27, %s434_s4 }
  0x24   :  { %338 = vperm.xlu1 %433, %v335_v39  }
  0x25   :  { %p441_p3 = por %p440_p2, %p439_p1 }
  0x27   :  { %394 = vmatpush3.bf16.xpose.msra.mxu0 %v130_v40  ;;  %p442_p4 = pnand %p441_p3, %p435_p0 }
  0x28   :  { %426 = vmatprep.subr.msk.bf16.mxu0 %vm107_vm0, %v48_v41 }
  0x2f   :  { %396 = vmatpush3.bf16.xpose.msra.mxu0 %v127_v44 }
  0x30   :  { %427 = vmatprep.subr.msk.bf16.mxu0 %vm107_vm0, %v47_v45 }
  0x37   :  { %398 = vmatpush3.bf16.xpose.msra.mxu0 %v124_v48 }
  0x38   :  { %428 = vmatprep.subr.msk.bf16.mxu0 %vm107_vm0, %v46_v49 }
  0x3f   :  { %400 = vmatpush3.bf16.xpose.msra.mxu0 %v121_v50 }
  0x46   :  { %402 = vmatmul.mubr.msk.bf16.vlgmr.msra.gmra.mxu0 %vm107_vm0, %v62_v55  ;;  %v341_v55 = vlaneseq }
  0x47   :  { %405 = vmatprep.mubr.msk.bf16.mxu0 %vm107_vm0, %v63_v56 }
  0x4e   :  { %406 = vmatmul.mubr.msk.bf16.gmra.mxu0 %vm107_vm0, %v64_v58  ;;  %v342_v58 = vshrl.u32 %v341_v55, 7 }
  0x50   :  { %v343_v61 = vsub.s32 0, %v342_v58 }
  0x81   :  { %v105_v62 = vpop.permute.xlu0 %104 }
  0x82   :  { %v100_v3 = vpop.permute.xlu1 %99 }
  0x85   :  { %v95_v1 = vpop.permute.xlu0 %94 }
  0x8b   :  { %v85_v10 = vpop.permute.xlu1 %84 }
  0x8c   :  { %v90_v7 = vpop.permute.xlu0 %89 }
  0x8f   :  { %v75_v24 = vpop.permute.xlu1 %74 }
  0x90   :  { %v80_v19 = vpop.permute.xlu0 %79 }
  0x93   :  { %v230_v34 = vpop.permute.xlu1 %229 }
  0x94   :  { %v235_v35 = vpop.permute.xlu0 %234 }
  0x97   :  { %v240_v37 = vpop.permute.xlu1 %239 }
  0x98   :  { %v310_v40 = vpop.permute.xlu0 %309 }
  0x9b   :  { %v315_v49 = vpop.permute.xlu1 %314 }
  0x9c   :  { %v320_v47 = vpop.permute.xlu0 %319 }
 0x106   :  { %v403_v63 = vpop.f32.mrf.mxu0 }
 0x107   :  { %v187_v16 = vadd.f32 %v403_v63, %v85_v10  ;;  %v339_v63 = vpop.permute.xlu1 %338 }
 0x108   :  { %v178_v0 = vpop.f32.mrf.mxu0 }
 0x109   :  { %v210_v25 = vmax.f32 %v187_v16, 0.0  ;;  %v179_v26 = vadd.f32 %v178_v0, %v75_v24 }
 0x10a   :  { %v404_v2 = vpop.f32.mrf.mxu0 }
 0x10b   :  { %v190_v12 = vadd.f32 %v404_v2, %v90_v7  ;;  %v208_v30 = vmax.f32 %v179_v26, 0.0 }
 0x10c   :  { %v181_v4 = vpop.f32.mrf.mxu0 }
 0x10d   :  { %v211_v20 = vmax.f32 %v190_v12, 0.0  ;;  %v182_v21 = vadd.f32 %v181_v4, %v80_v19 }
 0x10e   :  { %v407_v5 = vpop.f32.mrf.mxu0 }
 0x10f   :  { %v203_v6 = vadd.f32 %v407_v5, %v105_v62  ;;  %v221_v28 = vpack.c.bf16 %v211_v20, %v210_v25  ;;  %v209_v29 = vmax.f32 %v182_v21, 0.0 }
 0x110   :  { %v194_v8 = vpop.f32.mrf.mxu0 }
 0x111   :  { %v214_v9 = vmax.f32 %v203_v6, 0.0  ;;  %v195_v13 = vadd.f32 %v194_v8, %v95_v1  ;;  %v220_v31 = vpack.c.bf16 %v209_v29, %v208_v30  ;;  %v344_v1 = vrot.slane %v339_v63, %v343_v61 }
 0x112   :  { %v408_v11 = vpop.f32.mrf.mxu0 }
 0x113   :  { %v223_v14 = vpack.c.bf16 %v214_v9, %v214_v9  ;;  %v212_v22 = vmax.f32 %v195_v13, 0.0 }
 0x114   :  { %v197_v15 = vpop.f32.mrf.mxu0 }
 0x115   :  { %v198_v17 = vadd.f32 %v197_v15, %v100_v3  ;;  %429 = vmatprep.subr.msk.bf16.mxu1 %vm249_vm2, %v223_v14  ;;  %v251_v18 = vsel %vm249_vm2, %v223_v14, 0 }
 0x116   :  { %410 = vmatpush3.bf16.msra.mxu1 %v251_v18 }
 0x117   :  { %v213_v23 = vmax.f32 %v198_v17, 0.0 }
 0x119   :  { %v222_v27 = vpack.c.bf16 %v213_v23, %v212_v22 }
 0x11b   :  { %411 = vmatprep.subr.bf16.mxu1 %v222_v27 }
 0x11c   :  { %412 = vmatpush3.bf16.msra.mxu1 %v222_v27 }
 0x11d   :  { %413 = vmatprep.subr.bf16.mxu1 %v221_v28 }
 0x120   :  { %414 = vmatpush3.bf16.msra.mxu1 %v221_v28 }
 0x121   :  { %415 = vmatprep.subr.bf16.mxu1 %v220_v31 }
 0x124   :  { %416 = vmatpush3.bf16.msra.mxu1 %v220_v31 }
 0x127   :  { %418 = vmatmul.mubr.msk.bf16.vlgmr.msra.gmra.mxu1 %vm242_vm1, %v219_v33 }
 0x1e7   :  { %v419_v36 = vpop.f32.mrf.mxu1 }
 0x1e8   :  { %v296_v38 = vadd.f32 %v419_v36, %v240_v37 }
 0x1e9   :  { %v287_v39 = vpop.f32.mrf.mxu1 }
 0x1ea   :  { %v288_v41 = vadd.f32 %v287_v39, %v230_v34  ;;  %v303_v43 = vmax.f32 %v296_v38, 0.0 }
 0x1eb   :  { %v420_v42 = vpop.f32.mrf.mxu1 }
 0x1ec   :  { %v301_v45 = vmax.f32 %v288_v41, 0.0  ;;  %v324_v50 = vmul.f32 %v320_v47, %v303_v43 }
 0x1ed   :  { %v290_v44 = vpop.f32.mrf.mxu1 }
 0x1ee   :  { %v291_v46 = vadd.f32 %v290_v44, %v235_v35  ;;  %v322_v51 = vmul.f32 %v310_v40, %v301_v45  ;;  %v327_v54 = vsel %vm326_vm3, %v324_v50, 0.0 }
 0x1f0   :  { %v302_v48 = vmax.f32 %v291_v46, 0.0 }
 0x1f2   :  { %v323_v52 = vmul.f32 %v315_v49, %v302_v48 }
 0x1f4   :  { %v325_v53 = vadd.f32 %v323_v52, %v322_v51 }
 0x1f6   :  { %v328_v56 = vadd.f32 %v327_v54, %v325_v53 }
 0x1f8   :  { %v329_v57 = vrot.slane %v328_v56, 4 }
 0x1fa   :  { %v330_v59 = vadd.f32 %v329_v57, %v328_v56 }
 0x1fc   :  { %v331_v60 = vrot.slane %v330_v59, 2 }
 0x1fe   :  { %v332_v62 = vadd.f32 %v331_v60, %v330_v59 }
 0x200   :  { %v333_v0 = vrot.slane %v332_v62, 1 }
 0x202   :  { %v334_v2 = vadd.f32 %v333_v0, %v332_v62 }
 0x204   :  { %v345_v3 = vadd.f32 %v344_v1, %v334_v2 }
 0x206   :  { %346 = vst [vmem:[#allocation3] sm:$0x1] %v345_v3 }
 0x207   :  { %445 = shalt.err (!%p442_p4)
}
 0x208   :  { %356 = dma.vmem_to_hbm [thread:$0]  %s354_s26, 16, %s650_s7, [#allocation4]  }
 0x209   :  { %454 = dma.done.wait [#allocation4], 16  }
 0x20a   :  { %455 = vsyncadd [#allocation4], 4294967280 }
 0x20b   :  { %360 = vsyncpa [#allocation4], 1 }

</bundles_post_ra>
